<compile_context>
chip_gen: v7x
topology: tpu7x:2x2x1
jax: 0.10.0
libtpu: 0.0.40
codegen_flags: <defaults>
</compile_context>

<pallas_src>
import jax
import jax.numpy as jnp
from jax.experimental import pallas as pl
from jax.experimental.pallas import tpu as pltpu

LEAKY_SLOPE = 0.01            # torch.nn.functional.leaky_relu default negative_slope
LANE = 128                    # TPU lane width
_VMEM_BUDGET = 48 * 1024 * 1024   # conservative resident budget (fits v7x 64 MiB with headroom)


def _round_up(n, m):
    return ((n + m - 1) // m) * m


def _choose_block_b(B, footprint_fn=None, target=256, budget=_VMEM_BUDGET):
    """Batch tile: multiple of 16 rows (bf16 sublane pack), <= target, prefer >=2 grid
    steps, shrunk until the VMEM footprint fits the budget."""
    b16 = _round_up(max(B, 1), 16)
    if b16 <= 16:
        cand = 16
    else:
        cand = max(16, min(target, _round_up((b16 + 1) // 2, 16)))
    if footprint_fn is not None:
        while cand > 16 and footprint_fn(cand) > budget:
            cand = max(16, _round_up(cand // 2, 16))
    return cand


def _pick_tile(dim, target=512):
    """Largest multiple of LANE <= target that divides dim (dim is a multiple of LANE)."""
    t = min(target, dim)
    t = (t // LANE) * LANE
    while dim % t != 0:
        t -= LANE
    return t


# ---------------------------------------------------------------------------------------
# Fused MLP kernel (all weights resident in VMEM, batch-tiled grid)
# ---------------------------------------------------------------------------------------
def _make_fused_mlp_kernel(num_layers: int):
    """refs = (x, W0, b0, W1, b1, ..., W_{L-1}, b_{L-1}, out)."""

    def kernel(*refs):
        x_ref = refs[0]
        o_ref = refs[-1]
        h = x_ref[...].astype(jnp.bfloat16)          # no-op if the input is already bf16
        for i in range(num_layers):
            w = refs[1 + 2 * i][...]                 # bf16 (in_p, out_p), VMEM-resident
            b = refs[2 + 2 * i][...]                 # f32  (1, out_p) -> broadcasts
            acc = jnp.dot(h, w, preferred_element_type=jnp.float32) + b
            if i < num_layers - 1:
                # leaky_relu (slope < 1): max(x, slope*x) == where(x>0, x, slope*x)
                acc = jnp.maximum(acc, LEAKY_SLOPE * acc)
                h = acc.astype(jnp.bfloat16)         # bf16 operand for next MXU pass
            else:
                h = acc
        o_ref[...] = h.astype(o_ref.dtype)

    return kernel


# ---------------------------------------------------------------------------------------
# Per-layer fallback kernel: (M, N, K)-tiled matmul + bias (+ leaky_relu) for large layers
# ---------------------------------------------------------------------------------------
def _make_layer_kernel(apply_leaky_relu: bool):

    def kernel(x_ref, w_ref, b_ref, o_ref, acc_ref):
        k = pl.program_id(2)

        @pl.when(k == 0)
        def _():
            acc_ref[...] = jnp.zeros_like(acc_ref)

        acc_ref[...] += jnp.dot(x_ref[...].astype(w_ref.dtype), w_ref[...],
                                preferred_element_type=jnp.float32)

        @pl.when(k == pl.num_programs(2) - 1)
        def _():
            acc = acc_ref[...] + b_ref[...]
            if apply_leaky_relu:
                acc = jnp.maximum(acc, LEAKY_SLOPE * acc)
            o_ref[...] = acc.astype(o_ref.dtype)

    return kernel


def _pad_params(params):
    """Lane-pad weights (bf16) and biases (f32) to multiples of LANE."""
    padded = []
    for (w, b) in params:
        fi, fo = w.shape
        fi_p, fo_p = _round_up(fi, LANE), _round_up(fo, LANE)
        w_p = jnp.zeros((fi_p, fo_p), jnp.bfloat16).at[:fi, :fo].set(w.astype(jnp.bfloat16))
        b_p = jnp.zeros((1, fo_p), jnp.float32).at[:, :fo].set(b.astype(jnp.float32))
        padded.append((w_p, b_p))
    return padded


def _layerwise_forward(x_p, padded_params, block_b, out_dtype):
    """N/K-tiled fallback: one pallas_call per layer (used when resident weights would
    not fit the VMEM budget)."""
    num_layers = len(padded_params)
    B_pad = x_p.shape[0]
    h = x_p
    for li, (w_p, b_p) in enumerate(padded_params):
        K, N = w_p.shape
        tk = _pick_tile(K)
        tn = _pick_tile(N)
        is_last = li == num_layers - 1
        layer_dtype = out_dtype if is_last else jnp.bfloat16

        fp = (2 * block_b * tk * h.dtype.itemsize          # x blocks (double-buffered)
              + 2 * tk * tn * 2 + 2 * tn * 4               # w / b blocks
              + 2 * block_b * tn * jnp.dtype(layer_dtype).itemsize   # out blocks
              + block_b * tn * 4)                          # f32 accumulator scratch
        vmem_limit = int(min(max(4 * fp + (4 << 20), 32 << 20), 48 << 20))

        h = pl.pallas_call(
            _make_layer_kernel(not is_last),
            out_shape=jax.ShapeDtypeStruct((B_pad, N), layer_dtype),
            grid_spec=pltpu.PrefetchScalarGridSpec(
                num_scalar_prefetch=0,
                grid=(B_pad // block_b, N // tn, K // tk),
                in_specs=[pl.BlockSpec((block_b, tk), lambda i, j, k: (i, k)),
                          pl.BlockSpec((tk, tn), lambda i, j, k: (k, j)),
                          pl.BlockSpec((1, tn), lambda i, j, k: (0, j))],
                out_specs=pl.BlockSpec((block_b, tn), lambda i, j, k: (i, j)),
                scratch_shapes=[pltpu.VMEM((block_b, tn), jnp.float32)],
            ),
            compiler_params=pltpu.CompilerParams(
                dimension_semantics=("parallel", "parallel", "arbitrary"),
                vmem_limit_bytes=vmem_limit,
            ),
        )(h, w_p, b_p)
    return h


def encoder_forward(x, params, *, block_b=None, out_dtype=jnp.float32,
                    force_layerwise=False):
    """Encoder forward pass.

    x:      (B, input_dim) float32
    params: list of (W, b) with W: (in, out), b: (1, out)  (un-padded, f32)
    out_dtype: jnp.float32 (default, PyTorch parity) or jnp.bfloat16 (halves padded
               HBM writeback when downstream tolerates it).
    """
    B, in_dim = x.shape
    out_dim = params[-1][0].shape[1]
    num_layers = len(params)

    in_p = _round_up(in_dim, LANE)
    out_p = _round_up(out_dim, LANE)
    out_bytes = jnp.dtype(out_dtype).itemsize

    padded_params = _pad_params(params)

    max_feat_p = max([in_p] + [w.shape[1] for (w, _) in padded_params])
    resident_bytes = sum(w.size * w.dtype.itemsize + b.size * b.dtype.itemsize
                         for (w, b) in padded_params)

    def footprint(bb, x_bytes=4):
        f = 2 * bb * in_p * x_bytes            # double-buffered input block
        f += 2 * bb * out_p * out_bytes        # double-buffered output block
        f += resident_bytes                    # Buffered(1) resident weights/biases
        f += num_layers * bb * max_feat_p * 6  # live f32 acc + bf16 operand per layer
        return f

    use_layerwise = force_layerwise or footprint(16) > _VMEM_BUDGET

    if block_b is None:
        block_b = _choose_block_b(B, None if use_layerwise else footprint)
    B_pad = _round_up(B, block_b)

    if use_layerwise:
        x_p = jnp.zeros((B_pad, in_p), jnp.bfloat16).at[:B, :in_dim].set(
            x.astype(jnp.bfloat16))
        out_padded = _layerwise_forward(x_p, padded_params, block_b, out_dtype)
        return out_padded[:B, :out_dim]

    # --- fused path ---------------------------------------------------------------------
    need_pad = (in_dim != in_p) or (B != B_pad)
    if need_pad:
        # Wrapper-side lane/batch zero-pad + bf16 cast; allow_input_fusion lets XLA fuse
        # this producer into the pallas_call operand (no extra HBM round trip under jit).
        x_in = jnp.zeros((B_pad, in_p), jnp.bfloat16).at[:B, :in_dim].set(
            x.astype(jnp.bfloat16))
    else:
        # Already aligned: pass f32 straight through and cast to bf16 inside the kernel.
        x_in = x
    x_bytes = x_in.dtype.itemsize

    kernel = _make_fused_mlp_kernel(num_layers)

    in_specs = [pl.BlockSpec((block_b, in_p), lambda i: (i, 0))]
    flat_params = []
    for (w_p, b_p) in padded_params:
        # Constant index_map -> resident block; Buffered(1) avoids pointless 2x buffering.
        in_specs.append(pl.BlockSpec(w_p.shape, lambda i: (0, 0),
                                     pipeline_mode=pl.Buffered(1)))
        in_specs.append(pl.BlockSpec(b_p.shape, lambda i: (0, 0),
                                     pipeline_mode=pl.Buffered(1)))
        flat_params.extend([w_p, b_p])

    out_spec = pl.BlockSpec((block_b, out_p), lambda i: (i, 0))

    flops = sum(2 * B_pad * w.shape[0] * w.shape[1] for (w, _) in padded_params)
    bytes_accessed = (x_in.size * x_bytes + B_pad * out_p * out_bytes + resident_bytes)

    vmem_limit = int(min(max(int(footprint(block_b, x_bytes) * 1.25) + (2 << 20),
                             32 << 20), 56 << 20))

    allow_fusion = ([True] + [False] * (2 * num_layers)) if need_pad else None

    out_padded = pl.pallas_call(
        kernel,
        out_shape=jax.ShapeDtypeStruct((B_pad, out_p), out_dtype),
        grid_spec=pltpu.PrefetchScalarGridSpec(
            num_scalar_prefetch=0,
            grid=(B_pad // block_b,),
            in_specs=in_specs,
            out_specs=out_spec,
        ),
        compiler_params=pltpu.CompilerParams(
            dimension_semantics=("parallel",),
            vmem_limit_bytes=vmem_limit,
            allow_input_fusion=allow_fusion,
        ),
        cost_estimate=pl.CostEstimate(
            flops=int(flops),
            transcendentals=0,
            bytes_accessed=int(bytes_accessed),
        ),
    )(x_in, *flat_params)

    # Slice away batch / lane padding outside the kernel (cheap, fuses under jit).
    return out_padded[:B, :out_dim]


def init_encoder_params(key, input_dim, output_dim, num_hidden=3):
    """Deterministic init mirroring nn.Linear default (U(-1/sqrt(fan_in), 1/sqrt(fan_in)))."""
    hidden_dim = input_dim * 3
    dims = [(input_dim, hidden_dim)]
    for _ in range(num_hidden - 1):
        dims.append((hidden_dim, hidden_dim))
    dims.append((hidden_dim, output_dim))

    params = []
    for (fan_in, fan_out) in dims:
        key, kw, kb = jax.random.split(key, 3)
        bound = 1.0 / jnp.sqrt(fan_in)
        w = jax.random.uniform(kw, (fan_in, fan_out), jnp.float32, -bound, bound)
        b = jax.random.uniform(kb, (1, fan_out), jnp.float32, -bound, bound)
        params.append((w, b))
    return params


def encoder_reference(x, params, matmul_dtype=jnp.float32):
    """Plain-JAX reference for correctness checking (optionally bf16 matmul operands)."""
    h = x.astype(jnp.float32)
    for li, (w, b) in enumerate(params):
        y = jnp.dot(h.astype(matmul_dtype), w.astype(matmul_dtype),
                    preferred_element_type=jnp.float32) + b.astype(jnp.float32)
        if li < len(params) - 1:
            y = jnp.where(y > 0, y, LEAKY_SLOPE * y)
        h = y
    return h


if __name__ == "__main__":
    key = jax.random.PRNGKey(0)

    # Shapes consistent with the module: input_dim=32 -> hidden_dim=96, output_dim=16.
    B, input_dim, output_dim, num_hidden = 8, 32, 16, 3

    key, kx = jax.random.split(key)
    x = jax.random.normal(kx, (B, input_dim), jnp.float32)
    params = init_encoder_params(key, input_dim, output_dim, num_hidden)

    # --- fused path (padded input -> allow_input_fusion branch), under jit -------------
    fwd = jax.jit(encoder_forward)
    out = jax.block_until_ready(fwd(x, params))
    assert out.shape == (B, output_dim)

    ref_bf16 = encoder_reference(x, params, matmul_dtype=jnp.bfloat16)
    assert jnp.allclose(out, ref_bf16, atol=2e-2, rtol=2e-2), \
        "Pallas output mismatch vs bf16-matmul reference"

    ref_f32 = encoder_reference(x, params, matmul_dtype=jnp.float32)
    assert jnp.allclose(out, ref_f32, atol=1e-1, rtol=1e-1), \
        "Pallas output mismatch vs f32 reference"

    # --- layerwise (N/K-tiled) fallback path on the same tiny shapes --------------------
    out_lw = jax.block_until_ready(encoder_forward(x, params, force_layerwise=True))
    assert jnp.allclose(out_lw, ref_bf16, atol=2e-2, rtol=2e-2), \
        "Layerwise fallback mismatch vs bf16-matmul reference"

    # --- aligned fused path (no wrapper pad; f32 input cast to bf16 in-kernel) ----------
    B2, in2, out2 = 32, 128, 128
    key, kx2, kp2 = jax.random.split(key, 3)
    x2 = jax.random.normal(kx2, (B2, in2), jnp.float32)
    params2 = init_encoder_params(kp2, in2, out2, num_hidden=3)
    y2 = jax.block_until_ready(encoder_forward(x2, params2))
    ref2 = encoder_reference(x2, params2, matmul_dtype=jnp.bfloat16)
    assert y2.shape == (B2, out2)
    assert jnp.allclose(y2, ref2, atol=2e-2, rtol=2e-2), \
        "Aligned-path output mismatch vs bf16-matmul reference"

    print("KERNEL_OK")
</pallas_src>

<mosaic_0001>
module attributes {stable_mosaic.version = 11 : i64} {
  func.func @kernel(%arg0: i32, %arg1: memref<16x128xbf16, #tpu.memory_space<vmem>>, %arg2: memref<128x128xbf16, #tpu.memory_space<vmem>>, %arg3: memref<1x128xf32, #tpu.memory_space<vmem>>, %arg4: memref<128x128xbf16, #tpu.memory_space<vmem>>, %arg5: memref<1x128xf32, #tpu.memory_space<vmem>>, %arg6: memref<128x128xbf16, #tpu.memory_space<vmem>>, %arg7: memref<1x128xf32, #tpu.memory_space<vmem>>, %arg8: memref<128x128xbf16, #tpu.memory_space<vmem>>, %arg9: memref<1x128xf32, #tpu.memory_space<vmem>>, %arg10: memref<16x128xf32, #tpu.memory_space<vmem>>) attributes {dimension_semantics = [#tpu.dimension_semantics<parallel>], iteration_bounds = array<i64: 1>, scalar_prefetch = 0 : i64, scratch_operands = 0 : i64, tpu.core_type = #tpu.core_type<tc>, window_params = [{transform_indices = @transform_0, window_bounds = array<i64: 16, 128>}, {pipeline_mode = #tpu.pipeline_mode<synchronous>, transform_indices = @transform_1, window_bounds = array<i64: 128, 128>}, {pipeline_mode = #tpu.pipeline_mode<synchronous>, transform_indices = @transform_2, window_bounds = array<i64: 1, 128>}, {pipeline_mode = #tpu.pipeline_mode<synchronous>, transform_indices = @transform_3, window_bounds = array<i64: 128, 128>}, {pipeline_mode = #tpu.pipeline_mode<synchronous>, transform_indices = @transform_4, window_bounds = array<i64: 1, 128>}, {pipeline_mode = #tpu.pipeline_mode<synchronous>, transform_indices = @transform_5, window_bounds = array<i64: 128, 128>}, {pipeline_mode = #tpu.pipeline_mode<synchronous>, transform_indices = @transform_6, window_bounds = array<i64: 1, 128>}, {pipeline_mode = #tpu.pipeline_mode<synchronous>, transform_indices = @transform_7, window_bounds = array<i64: 128, 128>}, {pipeline_mode = #tpu.pipeline_mode<synchronous>, transform_indices = @transform_8, window_bounds = array<i64: 1, 128>}, {transform_indices = @transform_9, window_bounds = array<i64: 16, 128>}]} {
    %c0 = arith.constant 0 : index
    %c0_0 = arith.constant 0 : index
    %0 = vector.load %arg1[%c0, %c0_0] : memref<16x128xbf16, #tpu.memory_space<vmem>>, vector<16x128xbf16>
    %c0_1 = arith.constant 0 : index
    %c0_2 = arith.constant 0 : index
    %1 = vector.load %arg2[%c0_1, %c0_2] : memref<128x128xbf16, #tpu.memory_space<vmem>>, vector<128x128xbf16>
    %c0_3 = arith.constant 0 : index
    %c0_4 = arith.constant 0 : index
    %2 = vector.load %arg3[%c0_3, %c0_4] : memref<1x128xf32, #tpu.memory_space<vmem>>, vector<1x128xf32>
    %cst = arith.constant dense<0.000000e+00> : vector<16x128xf32>
    %3 = tpu.matmul %0, %1, %cst {dimension_numbers = #tpu.dot_dimension_numbers<[1], [0], [0], [1], [0, 0, 1, 1], [], []>} : vector<16x128xbf16>, vector<128x128xbf16>, vector<16x128xf32> -> vector<16x128xf32>
    %4 = vector.broadcast %2 : vector<1x128xf32> to vector<16x128xf32>
    %5 = arith.addf %3, %4 : vector<16x128xf32>
    %cst_5 = arith.constant 0.00999999977 : f32
    %6 = vector.broadcast %cst_5 : f32 to vector<16x128xf32>
    %7 = arith.mulf %6, %5 : vector<16x128xf32>
    %8 = arith.maximumf %5, %7 : vector<16x128xf32>
    %9 = arith.truncf %8 : vector<16x128xf32> to vector<16x128xbf16>
    %c0_6 = arith.constant 0 : index
    %c0_7 = arith.constant 0 : index
    %10 = vector.load %arg4[%c0_6, %c0_7] : memref<128x128xbf16, #tpu.memory_space<vmem>>, vector<128x128xbf16>
    %c0_8 = arith.constant 0 : index
    %c0_9 = arith.constant 0 : index
    %11 = vector.load %arg5[%c0_8, %c0_9] : memref<1x128xf32, #tpu.memory_space<vmem>>, vector<1x128xf32>
    %cst_10 = arith.constant dense<0.000000e+00> : vector<16x128xf32>
    %12 = tpu.matmul %9, %10, %cst_10 {dimension_numbers = #tpu.dot_dimension_numbers<[1], [0], [0], [1], [0, 0, 1, 1], [], []>} : vector<16x128xbf16>, vector<128x128xbf16>, vector<16x128xf32> -> vector<16x128xf32>
    %13 = vector.broadcast %11 : vector<1x128xf32> to vector<16x128xf32>
    %14 = arith.addf %12, %13 : vector<16x128xf32>
    %cst_11 = arith.constant 0.00999999977 : f32
    %15 = vector.broadcast %cst_11 : f32 to vector<16x128xf32>
    %16 = arith.mulf %15, %14 : vector<16x128xf32>
    %17 = arith.maximumf %14, %16 : vector<16x128xf32>
    %18 = arith.truncf %17 : vector<16x128xf32> to vector<16x128xbf16>
    %c0_12 = arith.constant 0 : index
    %c0_13 = arith.constant 0 : index
    %19 = vector.load %arg6[%c0_12, %c0_13] : memref<128x128xbf16, #tpu.memory_space<vmem>>, vector<128x128xbf16>
    %c0_14 = arith.constant 0 : index
    %c0_15 = arith.constant 0 : index
    %20 = vector.load %arg7[%c0_14, %c0_15] : memref<1x128xf32, #tpu.memory_space<vmem>>, vector<1x128xf32>
    %cst_16 = arith.constant dense<0.000000e+00> : vector<16x128xf32>
    %21 = tpu.matmul %18, %19, %cst_16 {dimension_numbers = #tpu.dot_dimension_numbers<[1], [0], [0], [1], [0, 0, 1, 1], [], []>} : vector<16x128xbf16>, vector<128x128xbf16>, vector<16x128xf32> -> vector<16x128xf32>
    %22 = vector.broadcast %20 : vector<1x128xf32> to vector<16x128xf32>
    %23 = arith.addf %21, %22 : vector<16x128xf32>
    %cst_17 = arith.constant 0.00999999977 : f32
    %24 = vector.broadcast %cst_17 : f32 to vector<16x128xf32>
    %25 = arith.mulf %24, %23 : vector<16x128xf32>
    %26 = arith.maximumf %23, %25 : vector<16x128xf32>
    %27 = arith.truncf %26 : vector<16x128xf32> to vector<16x128xbf16>
    %c0_18 = arith.constant 0 : index
    %c0_19 = arith.constant 0 : index
    %28 = vector.load %arg8[%c0_18, %c0_19] : memref<128x128xbf16, #tpu.memory_space<vmem>>, vector<128x128xbf16>
    %c0_20 = arith.constant 0 : index
    %c0_21 = arith.constant 0 : index
    %29 = vector.load %arg9[%c0_20, %c0_21] : memref<1x128xf32, #tpu.memory_space<vmem>>, vector<1x128xf32>
    %cst_22 = arith.constant dense<0.000000e+00> : vector<16x128xf32>
    %30 = tpu.matmul %27, %28, %cst_22 {dimension_numbers = #tpu.dot_dimension_numbers<[1], [0], [0], [1], [0, 0, 1, 1], [], []>} : vector<16x128xbf16>, vector<128x128xbf16>, vector<16x128xf32> -> vector<16x128xf32>
    %31 = vector.broadcast %29 : vector<1x128xf32> to vector<16x128xf32>
    %32 = arith.addf %30, %31 : vector<16x128xf32>
    %c0_23 = arith.constant 0 : index
    %c0_24 = arith.constant 0 : index
    %33 = vector.load %arg10[%c0_23, %c0_24] : memref<16x128xf32, #tpu.memory_space<vmem>>, vector<16x128xf32>
    tpu.vector_store %arg10[%c0_23, %c0_24], %32 {strides = array<i32>} : memref<16x128xf32, #tpu.memory_space<vmem>>, vector<16x128xf32>,
    return
  }
  func.func @transform_0(%arg0: i32) -> (i32, i32) {
    %c0_i32 = arith.constant 0 : i32
    %c0_i32_0 = arith.constant 0 : i32
    return %arg0, %c0_i32 : i32, i32
  }
  func.func @transform_1(%arg0: i32) -> (i32, i32) {
    %c0_i32 = arith.constant 0 : i32
    %c0_i32_0 = arith.constant 0 : i32
    %c0_i32_1 = arith.constant 0 : i32
    return %c0_i32, %c0_i32_0 : i32, i32
  }
  func.func @transform_2(%arg0: i32) -> (i32, i32) {
    %c0_i32 = arith.constant 0 : i32
    %c0_i32_0 = arith.constant 0 : i32
    %c0_i32_1 = arith.constant 0 : i32
    return %c0_i32, %c0_i32_0 : i32, i32
  }
  func.func @transform_3(%arg0: i32) -> (i32, i32) {
    %c0_i32 = arith.constant 0 : i32
    %c0_i32_0 = arith.constant 0 : i32
    %c0_i32_1 = arith.constant 0 : i32
    return %c0_i32, %c0_i32_0 : i32, i32
  }
  func.func @transform_4(%arg0: i32) -> (i32, i32) {
    %c0_i32 = arith.constant 0 : i32
    %c0_i32_0 = arith.constant 0 : i32
    %c0_i32_1 = arith.constant 0 : i32
    return %c0_i32, %c0_i32_0 : i32, i32
  }
  func.func @transform_5(%arg0: i32) -> (i32, i32) {
    %c0_i32 = arith.constant 0 : i32
    %c0_i32_0 = arith.constant 0 : i32
    %c0_i32_1 = arith.constant 0 : i32
    return %c0_i32, %c0_i32_0 : i32, i32
  }
  func.func @transform_6(%arg0: i32) -> (i32, i32) {
    %c0_i32 = arith.constant 0 : i32
    %c0_i32_0 = arith.constant 0 : i32
    %c0_i32_1 = arith.constant 0 : i32
    return %c0_i32, %c0_i32_0 : i32, i32
  }
  func.func @transform_7(%arg0: i32) -> (i32, i32) {
    %c0_i32 = arith.constant 0 : i32
    %c0_i32_0 = arith.constant 0 : i32
    %c0_i32_1 = arith.constant 0 : i32
    return %c0_i32, %c0_i32_0 : i32, i32
  }
  func.func @transform_8(%arg0: i32) -> (i32, i32) {
    %c0_i32 = arith.constant 0 : i32
    %c0_i32_0 = arith.constant 0 : i32
    %c0_i32_1 = arith.constant 0 : i32
    return %c0_i32, %c0_i32_0 : i32, i32
  }
  func.func @transform_9(%arg0: i32) -> (i32, i32) {
    %c0_i32 = arith.constant 0 : i32
    %c0_i32_0 = arith.constant 0 : i32
    return %arg0, %c0_i32 : i32, i32
  }
}

</mosaic_0001>

<bundles_post_ra>
// kernel: encoder_forward.2
= control target key start
LH: loop header
LB: loop body
LE: loop exit
PB: predicated region body
PF: predicated region fallthrough
CT: control target
= control target key end

     0   :  { %s950_s0 = inlined_call_operand.vmem [shape: bf16[128,128], index: 0, kind: input, shape index: {}]   ;;  %s951_s1 = inlined_call_operand.vmem [shape: f32[1,128], index: 1, kind: input, shape index: {}]   ;;  %s952_s2 = inlined_call_operand.vmem [shape: bf16[128,128], index: 2, kind: input, shape index: {}]   ;;  %s953_s3 = inlined_call_operand.vmem [shape: f32[1,128], index: 3, kind: input, shape index: {}]   ;;  %s954_s4 = inlined_call_operand.vmem [shape: bf16[128,128], index: 4, kind: input, shape index: {}]   ;;  %s955_s5 = inlined_call_operand.vmem [shape: f32[1,128], index: 5, kind: input, shape index: {}]   ;;  %s956_s6 = inlined_call_operand.vmem [shape: bf16[128,128], index: 6, kind: input, shape index: {}]   ;;  %s957_s7 = inlined_call_operand.vmem [shape: f32[1,128], index: 7, kind: input, shape index: {}]   ;;  %s958_s8 = inlined_call_operand.vmem [shape: bf16[8,32], index: 8, kind: input, shape index: {}]   ;;  %s959_s9 = inlined_call_operand.<no memory space> [shape: bf16[], index: 9, kind: input, shape index: {}]   ;;  %s960_s10 = inlined_call_operand.vmem [shape: f32[16,128], index: 10, kind: output, shape index: {}]  }
   0x1   :  { %v15_v0 = vstv %s959_s9 }
   0x2   :  { %v16_v1 = vunpack.i.l.bf16 %v15_v0 }
   0x3   :  { %v700_v2 = vld [vmem:[%s950_s0] sm:$0xff]   ;;  %v50_v3 = vlaneseq  ;;  %v733_v4 = vmov 0.0   ;;  %v701_v5 = vld [vmem:[%s950_s0 + $0x8] sm:$0xff]   ;;  %vm734_vm0 = vmmov 0   ;;  %v702_v7 = vld [vmem:[%s950_s0 + $0x10] sm:$0xff]  }
   0x4   :  { %618 = vmatprep.subr.bf16.mxu0 %v733_v4  ;;  %638 = vmatprep.subr.bf16.mxu1 %v733_v4  ;;  %v47_v8 = vld [vmem:[%s958_s8] sm:$0xf]  ;;  %v703_v11 = vld [vmem:[%s950_s0 + $0x18] sm:$0xff]   ;;  %v710_v13 = vld [vmem:[%s952_s2 + $0x8] sm:$0xff]  }
   0x5   :  { %619 = vmatpush3.bf16.msra.mxu0 %v700_v2  ;;  %634 = vmatprep.mubr.msk.bf16.mxu0 %vm734_vm0, %v733_v4  ;;  %v51_v6 = vand.u32 127, %v50_v3  ;;  %v48_v9 = vunpack.c.l.bf16 %v47_v8  ;;  %v709_v10 = vld [vmem:[%s952_s2] sm:$0xff]   ;;  %v711_v16 = vld [vmem:[%s952_s2 + $0x10] sm:$0xff]   ;;  %v705_v17 = vld [vmem:[%s950_s0 + $0x28] sm:$0xff]  }
   0x6   :  { %620 = vmatprep.subr.bf16.mxu0 %v733_v4  ;;  %654 = vmatprep.mubr.msk.bf16.mxu1 %vm734_vm0, %v733_v4  ;;  %v704_v15 = vld [vmem:[%s950_s0 + $0x20] sm:$0xff]   ;;  %v712_v18 = vld [vmem:[%s952_s2 + $0x18] sm:$0xff]   ;;  %v706_v19 = vld [vmem:[%s950_s0 + $0x30] sm:$0xff]  }
   0x7   :  { %vm53_vm1 = vcmp.lt.s32.totalorder %v51_v6, 32  ;;  %639 = vmatpush3.bf16.msra.mxu1 %v709_v10  ;;  %v713_v20 = vld [vmem:[%s952_s2 + $0x20] sm:$0xff]   ;;  %v707_v21 = vld [vmem:[%s950_s0 + $0x38] sm:$0xff]   ;;  %v714_v23 = vld [vmem:[%s952_s2 + $0x28] sm:$0xff]  }
   0x8   :  { %v54_v12 = vsel %vm53_vm1, %v48_v9, %v16_v1  ;;  %640 = vmatprep.subr.bf16.mxu1 %v733_v4  ;;  %v715_v24 = vld [vmem:[%s952_s2 + $0x30] sm:$0xff]   ;;  %v716_v25 = vld [vmem:[%s952_s2 + $0x38] sm:$0xff]   ;;  %v717_v26 = vld [vmem:[%s954_s4] sm:$0xff]  }
   0x9   :  { %621 = vmatpush3.bf16.msra.mxu0 %v701_v5  ;;  %v580_v14 = vpack.c.bf16 %v16_v1, %v54_v12  ;;  %v718_v27 = vld [vmem:[%s954_s4 + $0x8] sm:$0xff]   ;;  %v719_v28 = vld [vmem:[%s954_s4 + $0x10] sm:$0xff]   ;;  %v720_v29 = vld [vmem:[%s954_s4 + $0x18] sm:$0xff]  }
   0xa   :  { %622 = vmatprep.subr.bf16.mxu0 %v733_v4  ;;  %v721_v30 = vld [vmem:[%s954_s4 + $0x20] sm:$0xff]   ;;  %v722_v43 = vld [vmem:[%s954_s4 + $0x28] sm:$0xff]   ;;  %v723_v44 = vld [vmem:[%s954_s4 + $0x30] sm:$0xff]  }
   0xb   :  { %581 = vst [vmem:[#allocation7] sm:$0xff] %v580_v14   ;;  %641 = vmatpush3.bf16.msra.mxu1 %v710_v13  ;;  %v540_v31 = vld [vmem:[%s951_s1] ss:$0 sm:$0xff]  ;;  %v724_v45 = vld [vmem:[%s954_s4 + $0x38] sm:$0xff]   ;;  %v726_v47 = vld [vmem:[%s956_s6 + $0x8] sm:$0xff]  }
   0xc   :  { %642 = vmatprep.subr.bf16.mxu1 %v733_v4  ;;  %v725_v46 = vld [vmem:[%s956_s6] sm:$0xff]   ;;  %v727_v48 = vld [vmem:[%s956_s6 + $0x10] sm:$0xff]   ;;  %v728_v49 = vld [vmem:[%s956_s6 + $0x18] sm:$0xff]  }
   0xd   :  { %623 = vmatpush3.bf16.msra.mxu0 %v702_v7  ;;  %v729_v50 = vld [vmem:[%s956_s6 + $0x20] sm:$0xff]   ;;  %v730_v63 = vld [vmem:[%s956_s6 + $0x28] sm:$0xff]   ;;  %v731_v0 = vld [vmem:[%s956_s6 + $0x30] sm:$0xff]  }
   0xe   :  { %624 = vmatprep.subr.bf16.mxu0 %v733_v4  ;;  %v550_v51 = vld [vmem:[%s953_s3] ss:$0 sm:$0xff]  ;;  %v732_v1 = vld [vmem:[%s956_s6 + $0x38] sm:$0xff]  }
   0xf   :  { %643 = vmatpush3.bf16.msra.mxu1 %v711_v16  ;;  %v559_v2 = vld [vmem:[%s955_s5] ss:$0 sm:$0xff] }
  0x10   :  { %644 = vmatprep.subr.bf16.mxu1 %v733_v4  ;;  %v568_v14 = vld [vmem:[%s957_s7] ss:$0 sm:$0xff] }
  0x11   :  { %625 = vmatpush3.bf16.msra.mxu0 %v703_v11 }
  0x12   :  { %626 = vmatprep.subr.bf16.mxu0 %v733_v4  ;;  %v708_v22 = vld [vmem:[#allocation7] sm:$0xff]  }
  0x13   :  { %645 = vmatpush3.bf16.msra.mxu1 %v712_v18 }
  0x14   :  { %646 = vmatprep.subr.bf16.mxu1 %v733_v4 }
  0x15   :  { %627 = vmatpush3.bf16.msra.mxu0 %v704_v15 }
  0x16   :  { %628 = vmatprep.subr.bf16.mxu0 %v733_v4 }
  0x17   :  { %647 = vmatpush3.bf16.msra.mxu1 %v713_v20 }
  0x18   :  { %648 = vmatprep.subr.bf16.mxu1 %v733_v4 }
  0x19   :  { %629 = vmatpush3.bf16.msra.mxu0 %v705_v17 }
  0x1a   :  { %630 = vmatprep.subr.bf16.mxu0 %v733_v4 }
  0x1b   :  { %649 = vmatpush3.bf16.msra.mxu1 %v714_v23 }
  0x1c   :  { %650 = vmatprep.subr.bf16.mxu1 %v733_v4 }
  0x1d   :  { %631 = vmatpush3.bf16.msra.mxu0 %v706_v19 }
  0x1e   :  { %632 = vmatprep.subr.bf16.mxu0 %v733_v4 }
  0x1f   :  { %651 = vmatpush3.bf16.msra.mxu1 %v715_v24 }
  0x20   :  { %652 = vmatprep.subr.bf16.mxu1 %v733_v4 }
  0x21   :  { %633 = vmatpush3.bf16.msra.mxu0 %v707_v21 }
  0x22   :  { %658 = vmatprep.subr.bf16.mxu0 %v733_v4 }
  0x23   :  { %653 = vmatpush3.bf16.msra.mxu1 %v716_v25 }
  0x24   :  { %635 = vmatmul.mubr.bf16.vlgmr.msra.gmra.mrb[0].mxu0 %v708_v22  ;;  %678 = vmatprep.subr.bf16.mxu1 %v733_v4 }
  0x25   :  { %674 = vmatprep.mubr.msk.bf16.mxu0 %vm734_vm0, %v733_v4  ;;  %659 = vmatpush3.bf16.msra.mxu0 %v717_v26 }
  0x26   :  { %660 = vmatprep.subr.bf16.mxu0 %v733_v4 }
  0x29   :  { %661 = vmatpush3.bf16.msra.mxu0 %v718_v27 }
  0x2a   :  { %662 = vmatprep.subr.bf16.mxu0 %v733_v4 }
  0x2d   :  { %663 = vmatpush3.bf16.msra.mxu0 %v719_v28 }
  0x2e   :  { %664 = vmatprep.subr.bf16.mxu0 %v733_v4 }
  0x31   :  { %665 = vmatpush3.bf16.msra.mxu0 %v720_v29 }
  0x32   :  { %666 = vmatprep.subr.bf16.mxu0 %v733_v4 }
  0x35   :  { %667 = vmatpush3.bf16.msra.mxu0 %v721_v30 }
  0x36   :  { %668 = vmatprep.subr.bf16.mxu0 %v733_v4 }
  0x39   :  { %669 = vmatpush3.bf16.msra.mxu0 %v722_v43 }
  0x3a   :  { %670 = vmatprep.subr.bf16.mxu0 %v733_v4 }
  0x3d   :  { %671 = vmatpush3.bf16.msra.mxu0 %v723_v44 }
  0x3e   :  { %672 = vmatprep.subr.bf16.mxu0 %v733_v4 }
  0x41   :  { %673 = vmatpush3.bf16.msra.mxu0 %v724_v45 }
  0xf7   :  { %v176_v32 = vpop.f32.mrb[0].mxu0 }
  0xf8   :  { %v177_v33 = vadd.f32 %v540_v31, %v176_v32  ;;  %v636_v34 = vpop.f32.mrb[1].mxu0 }
  0xf9   :  { %v179_v35 = vpop.f32.mrb[2].mxu0 }
  0xfa   :  { %v183_v36 = vmul.f32 0.01, %v177_v33  ;;  %v180_v37 = vadd.f32 %v540_v31, %v179_v35  ;;  %v637_v38 = vpop.f32.mrb[3].mxu0 }
  0xfc   :  { %v184_v39 = vmul.f32 0.01, %v180_v37  ;;  %v185_v40 = vmax.f32 %v177_v33, %v183_v36 }
  0xfe   :  { %v186_v41 = vmax.f32 %v180_v37, %v184_v39 }
 0x100   :  { %v187_v42 = vpack.c.bf16 %v186_v41, %v185_v40 }
 0x102   :  { %655 = vmatmul.mubr.bf16.vlgmr.msra.gmra.mrb[0].mxu1 %v187_v42 }
 0x103   :  { %694 = vmatprep.mubr.msk.bf16.mxu1 %vm734_vm0, %v733_v4  ;;  %679 = vmatpush3.bf16.msra.mxu1 %v725_v46 }
 0x104   :  { %680 = vmatprep.subr.bf16.mxu1 %v733_v4 }
 0x107   :  { %681 = vmatpush3.bf16.msra.mxu1 %v726_v47 }
 0x108   :  { %682 = vmatprep.subr.bf16.mxu1 %v733_v4 }
 0x10b   :  { %683 = vmatpush3.bf16.msra.mxu1 %v727_v48 }
 0x10c   :  { %684 = vmatprep.subr.bf16.mxu1 %v733_v4 }
 0x10f   :  { %685 = vmatpush3.bf16.msra.mxu1 %v728_v49 }
 0x110   :  { %686 = vmatprep.subr.bf16.mxu1 %v733_v4 }
 0x113   :  { %687 = vmatpush3.bf16.msra.mxu1 %v729_v50 }
 0x114   :  { %688 = vmatprep.subr.bf16.mxu1 %v733_v4 }
 0x117   :  { %689 = vmatpush3.bf16.msra.mxu1 %v730_v63 }
 0x118   :  { %690 = vmatprep.subr.bf16.mxu1 %v733_v4 }
 0x11b   :  { %691 = vmatpush3.bf16.msra.mxu1 %v731_v0 }
 0x11c   :  { %692 = vmatprep.subr.bf16.mxu1 %v733_v4 }
 0x11f   :  { %693 = vmatpush3.bf16.msra.mxu1 %v732_v1 }
 0x1d5   :  { %v293_v52 = vpop.f32.mrb[0].mxu1 }
 0x1d6   :  { %v294_v53 = vadd.f32 %v550_v51, %v293_v52  ;;  %v656_v54 = vpop.f32.mrb[1].mxu1 }
 0x1d7   :  { %v296_v55 = vpop.f32.mrb[2].mxu1 }
 0x1d8   :  { %v300_v56 = vmul.f32 0.01, %v294_v53  ;;  %v297_v57 = vadd.f32 %v550_v51, %v296_v55  ;;  %v657_v58 = vpop.f32.mrb[3].mxu1 }
 0x1da   :  { %v301_v59 = vmul.f32 0.01, %v297_v57  ;;  %v302_v60 = vmax.f32 %v294_v53, %v300_v56 }
 0x1dc   :  { %v303_v61 = vmax.f32 %v297_v57, %v301_v59 }
 0x1de   :  { %v304_v62 = vpack.c.bf16 %v303_v61, %v302_v60 }
 0x1e0   :  { %675 = vmatmul.mubr.bf16.vlgmr.msra.gmra.mrb[4].mxu0 %v304_v62 }
 0x2b3   :  { %v410_v3 = vpop.f32.mrb[4].mxu0 }
 0x2b4   :  { %v411_v5 = vadd.f32 %v559_v2, %v410_v3  ;;  %v676_v6 = vpop.f32.mrb[5].mxu0 }
 0x2b5   :  { %v413_v7 = vpop.f32.mrb[6].mxu0 }
 0x2b6   :  { %v417_v8 = vmul.f32 0.01, %v411_v5  ;;  %v414_v9 = vadd.f32 %v559_v2, %v413_v7  ;;  %v677_v10 = vpop.f32.mrb[7].mxu0 }
 0x2b8   :  { %v418_v11 = vmul.f32 0.01, %v414_v9  ;;  %v419_v12 = vmax.f32 %v411_v5, %v417_v8 }
 0x2ba   :  { %v420_v13 = vmax.f32 %v414_v9, %v418_v11 }
 0x2bc   :  { %v421_v4 = vpack.c.bf16 %v420_v13, %v419_v12 }
 0x2be   :  { %695 = vmatmul.mubr.bf16.vlgmr.msra.gmra.mrb[4].mxu1 %v421_v4 }
 0x391   :  { %v527_v15 = vpop.f32.mrb[4].mxu1 }
 0x392   :  { %v528_v16 = vadd.f32 %v568_v14, %v527_v15  ;;  %v696_v17 = vpop.f32.mrb[5].mxu1 }
 0x393   :  { %v530_v18 = vpop.f32.mrb[6].mxu1 }
 0x394   :  { %534 = vst [vmem:[%s960_s10] sm:$0xff] %v528_v16  ;;  %v531_v19 = vadd.f32 %v568_v14, %v530_v18  ;;  %v697_v20 = vpop.f32.mrb[7].mxu1 }
 0x396   :  { %535 = vst [vmem:[%s960_s10 + $0x8] sm:$0xff] %v531_v19 }

</bundles_post_ra>
